<compile_context>
chip_gen: v5e
topology: v5e:2x2
jax: 0.10.0
libtpu: 0.0.40
codegen_flags: <defaults>
</compile_context>

<pallas_src>
import functools

import jax
import jax.numpy as jnp
from jax.experimental import pallas as pl
from jax.experimental.pallas import tpu as pltpu


def _round_up(x, m):
    return ((x + m - 1) // m) * m


def _vmem_capacity_bytes():
    try:
        return int(pltpu.get_tpu_info().vmem_capacity_bytes)
    except Exception:  # pragma: no cover - conservative fallback (v7x per-core VMEM)
        return 64 * 1024 * 1024


def _cconv_tap_kernel(ws_ref, xr_ref, xi_ref, bsum_ref, bdif_ref,
                      or_ref, oi_ref, *, c_out_pad, c_in_pad, l_out_pad, taps):
    # ws_ref   : (K, 2*c_out_pad, c_in_pad)   per-tap rows [0:c_out_pad]=w_r, rest=w_i
    # xr_ref   : (1, phases*c_in_pad, l_sub)  real activations (phase-decomposed)
    # xi_ref   : (1, phases*c_in_pad, l_sub)  imag activations
    # bsum_ref : (c_out_pad, 1) f32           br + bi
    # bdif_ref : (c_out_pad, 1) f32           br - bi
    # or_ref   : (1, c_out_pad, l_out_pad)
    # oi_ref   : (1, c_out_pad, l_out_pad)
    pr = None   # [conv_r(x_r); conv_i(x_r)]  f32 (2*c_out_pad, l_out_pad)
    pi = None   # [conv_r(x_i); conv_i(x_i)]
    for kk, (phase, off) in enumerate(taps):
        w_k = ws_ref[kk]                                   # (2*c_out_pad, c_in_pad)
        r0 = phase * c_in_pad
        xr_win = xr_ref[0, r0:r0 + c_in_pad, off:off + l_out_pad]
        xi_win = xi_ref[0, r0:r0 + c_in_pad, off:off + l_out_pad]
        cr = jnp.dot(w_k, xr_win, preferred_element_type=jnp.float32)
        ci = jnp.dot(w_k, xi_win, preferred_element_type=jnp.float32)
        pr = cr if pr is None else pr + cr
        pi = ci if pi is None else pi + ci
    rr, ir = pr[:c_out_pad], pr[c_out_pad:]                # conv_r(x_r), conv_i(x_r)
    ri, ii = pi[:c_out_pad], pi[c_out_pad:]                # conv_r(x_i), conv_i(x_i)
    or_ref[0] = (rr - ii + bdif_ref[...]).astype(or_ref.dtype)
    oi_ref[0] = (ri + ir + bsum_ref[...]).astype(oi_ref.dtype)


def complex_conv1d(xr, xi, wr, wi, br=None, bi=None, *, stride=1, padding=0,
                   dilation=1, groups=1, compute_dtype=None):
    """Pallas ComplexConv1d forward. xr/xi: (N, C_in, L). Returns (out_r, out_i)."""
    if groups != 1:
        raise NotImplementedError("groups != 1 not supported")  # TODO(synk)

    n, c_in, length = xr.shape
    c_out, c_in_w, k = wr.shape
    assert c_in_w == c_in, "channel mismatch"

    out_dtype = xr.dtype
    if compute_dtype is None:
        compute_dtype = jnp.bfloat16 if out_dtype == jnp.float32 else out_dtype
    compute_dtype = jnp.dtype(compute_dtype)

    l_out = (length + 2 * padding - dilation * (k - 1) - 1) // stride + 1
    assert l_out > 0, "empty output length"

    # --- alignment / padding choices (sublane-aligned slices, lane-dense IO) ---
    sub = 8 if compute_dtype.itemsize >= 4 else 16
    c_out_pad = _round_up(c_out, 8)                       # f32 accumulator split stays aligned
    c_in_pad = c_in if stride == 1 else _round_up(c_in, sub)
    l_out_pad = _round_up(l_out, 128)                     # lane-dense output stores
    max_off = ((k - 1) * dilation) // stride
    l_sub = max(l_out_pad + max_off, pl.cdiv(length + 2 * padding, stride))
    l_tot = l_sub * stride
    rows_x = stride * c_in_pad                            # == c_in when stride == 1

    # --- wrapper-side layout plumbing (single cheap pass over activations) ---
    def prep(x):
        xp = jnp.pad(x, ((0, 0), (0, 0), (padding, l_tot - length - padding)))
        xp = xp.astype(compute_dtype)
        if stride == 1:
            return xp                                                    # (N, C_in, l_sub)
        x4 = xp.reshape(n, c_in, l_sub, stride).transpose(0, 3, 1, 2)    # (N, s, C_in, l_sub)
        if c_in_pad != c_in:
            x4 = jnp.pad(x4, ((0, 0), (0, 0), (0, c_in_pad - c_in), (0, 0)))
        return x4.reshape(n, rows_x, l_sub)

    xr_s = prep(xr)
    xi_s = prep(xi)

    # Per-tap stacked weights: ws[kk] = [[w_r[:, :, kk]], [w_i[:, :, kk]]] (padded).
    def prep_w(w):
        wt = jnp.transpose(w, (2, 0, 1))                                  # (K, C_out, C_in)
        return jnp.pad(wt, ((0, 0), (0, c_out_pad - c_out), (0, c_in_pad - c_in)))
    ws = jnp.concatenate([prep_w(wr), prep_w(wi)], axis=1).astype(compute_dtype)

    if br is None:
        br = jnp.zeros((c_out,), jnp.float32)
    if bi is None:
        bi = jnp.zeros((c_out,), jnp.float32)
    bsum = jnp.pad((br + bi).astype(jnp.float32), (0, c_out_pad - c_out)).reshape(c_out_pad, 1)
    bdif = jnp.pad((br - bi).astype(jnp.float32), (0, c_out_pad - c_out)).reshape(c_out_pad, 1)

    # Static (phase, lane-offset) per tap: x_pad[l*s + kk*d] == xs[phase, l + offset].
    taps = tuple((int((kk * dilation) % stride), int((kk * dilation) // stride))
                 for kk in range(k))

    kern = functools.partial(_cconv_tap_kernel, c_out_pad=c_out_pad,
                             c_in_pad=c_in_pad, l_out_pad=l_out_pad, taps=taps)

    # --- VMEM budget (generation-aware) and compiler params ---
    in_item = compute_dtype.itemsize
    out_item = jnp.dtype(out_dtype).itemsize
    per_step = (2 * (2 * rows_x * l_sub * in_item)                 # xr+xi, double-buffered
                + 2 * (2 * c_out_pad * l_out_pad * out_item)       # 2 outputs, double-buffered
                + 2 * (ws.size * in_item + 2 * c_out_pad * 4)      # weights + biases
                + 2 * (2 * c_out_pad) * l_out_pad * 4)             # f32 accumulators
    vmem_cap = _vmem_capacity_bytes() * 3 // 4                     # ~48 MiB v7x, ~96 MiB v5e/v6e
    vmem_limit = int(min(max(per_step + (4 << 20), 32 << 20), vmem_cap))

    flops = 2 * 2 * n * k * (2 * c_out_pad) * c_in_pad * l_out_pad
    bytes_accessed = (2 * n * rows_x * l_sub * in_item
                      + 2 * n * c_out_pad * l_out_pad * out_item
                      + ws.size * in_item)

    out_struct = jax.ShapeDtypeStruct((n, c_out_pad, l_out_pad), out_dtype)

    out_r_p, out_i_p = pl.pallas_call(
        kern,
        out_shape=(out_struct, out_struct),
        grid=(n,),
        in_specs=[
            pl.BlockSpec((k, 2 * c_out_pad, c_in_pad), lambda b: (0, 0, 0)),   # ws (resident)
            pl.BlockSpec((1, rows_x, l_sub), lambda b: (b, 0, 0)),             # xr
            pl.BlockSpec((1, rows_x, l_sub), lambda b: (b, 0, 0)),             # xi
            pl.BlockSpec((c_out_pad, 1), lambda b: (0, 0)),                    # bsum
            pl.BlockSpec((c_out_pad, 1), lambda b: (0, 0)),                    # bdif
        ],
        out_specs=(
            pl.BlockSpec((1, c_out_pad, l_out_pad), lambda b: (b, 0, 0)),
            pl.BlockSpec((1, c_out_pad, l_out_pad), lambda b: (b, 0, 0)),
        ),
        compiler_params=pltpu.CompilerParams(
            dimension_semantics=("parallel",),
            vmem_limit_bytes=vmem_limit),
        cost_estimate=pl.CostEstimate(flops=flops, transcendentals=0,
                                      bytes_accessed=bytes_accessed),
    )(ws, xr_s, xi_s, bsum, bdif)

    # Strip channel / length padding (outputs are already (N, C_out, L_out) layout).
    out_r = out_r_p[:, :c_out, :l_out]
    out_i = out_i_p[:, :c_out, :l_out]
    return out_r, out_i


def _conv1d_ref(x, w, b, stride, padding, dilation):
    out = jax.lax.conv_general_dilated(
        x, w, window_strides=(stride,), padding=[(padding, padding)],
        rhs_dilation=(dilation,), dimension_numbers=("NCH", "OIH", "NCH"))
    return out + b[None, :, None]


if __name__ == "__main__":
    # Module config: ComplexConv1d(in_channels=4, out_channels=8), kernel_size=3.
    N, C_IN, C_OUT, L, K = 2, 4, 8, 16, 3

    key = jax.random.PRNGKey(0)
    k_xr, k_xi, k_wr, k_wi, k_br, k_bi = jax.random.split(key, 6)

    xr = jax.random.normal(k_xr, (N, C_IN, L), dtype=jnp.float32)
    xi = jax.random.normal(k_xi, (N, C_IN, L), dtype=jnp.float32)

    fan_in = C_IN * K
    bound = 1.0 / (fan_in ** 0.5)
    wr = jax.random.uniform(k_wr, (C_OUT, C_IN, K), jnp.float32, -bound, bound)
    wi = jax.random.uniform(k_wi, (C_OUT, C_IN, K), jnp.float32, -bound, bound)
    br = jax.random.uniform(k_br, (C_OUT,), jnp.float32, -bound, bound)
    bi = jax.random.uniform(k_bi, (C_OUT,), jnp.float32, -bound, bound)

    # (stride, padding, dilation): default; strided+padded+dilated; and a config
    # that exercises non-trivial stride phases in the decomposition.
    configs = [(1, 0, 1), (2, 1, 2), (2, 2, 1)]
    for (s, p, d) in configs:
        ref_r = _conv1d_ref(xr, wr, br, s, p, d) - _conv1d_ref(xi, wi, bi, s, p, d)
        ref_i = _conv1d_ref(xi, wr, br, s, p, d) + _conv1d_ref(xr, wi, bi, s, p, d)

        # Exact path (f32 compute) — validates the tap/phase algorithm tightly.
        o_r, o_i = complex_conv1d(xr, xi, wr, wi, br, bi, stride=s, padding=p,
                                  dilation=d, compute_dtype=jnp.float32)
        jax.block_until_ready((o_r, o_i))
        assert o_r.shape == ref_r.shape and o_i.shape == ref_i.shape
        assert jnp.allclose(o_r, ref_r, atol=1e-5, rtol=1e-5)
        assert jnp.allclose(o_i, ref_i, atol=1e-5, rtol=1e-5)

        # Default perf path (bf16 activations/weights, f32 accumulation).
        o_r16, o_i16 = complex_conv1d(xr, xi, wr, wi, br, bi, stride=s,
                                      padding=p, dilation=d)
        jax.block_until_ready((o_r16, o_i16))
        assert o_r16.shape == ref_r.shape and o_i16.shape == ref_i.shape
        assert jnp.allclose(o_r16, ref_r, atol=1e-1, rtol=5e-2)
        assert jnp.allclose(o_i16, ref_i, atol=1e-1, rtol=5e-2)

    print("KERNEL_OK")
</pallas_src>

<mosaic_0001>
module attributes {stable_mosaic.version = 11 : i64} {
  func.func @_cconv_tap_kernel(%arg0: i32, %arg1: memref<3x16x4xf32, #tpu.memory_space<vmem>>, %arg2: memref<1x4x130xf32, #tpu.memory_space<vmem>>, %arg3: memref<1x4x130xf32, #tpu.memory_space<vmem>>, %arg4: memref<8x1xf32, #tpu.memory_space<vmem>>, %arg5: memref<8x1xf32, #tpu.memory_space<vmem>>, %arg6: memref<1x8x128xf32, #tpu.memory_space<vmem>>, %arg7: memref<1x8x128xf32, #tpu.memory_space<vmem>>) attributes {dimension_semantics = [#tpu.dimension_semantics<parallel>], iteration_bounds = array<i64: 2>, scalar_prefetch = 0 : i64, scratch_operands = 0 : i64, tpu.core_type = #tpu.core_type<tc>, window_params = [{pipeline_mode = #tpu.pipeline_mode<synchronous>, transform_indices = @transform_0, window_bounds = array<i64: 3, 16, 4>}, {transform_indices = @transform_1, window_bounds = array<i64: 1, 4, 130>}, {transform_indices = @transform_2, window_bounds = array<i64: 1, 4, 130>}, {pipeline_mode = #tpu.pipeline_mode<synchronous>, transform_indices = @transform_3, window_bounds = array<i64: 8, 1>}, {pipeline_mode = #tpu.pipeline_mode<synchronous>, transform_indices = @transform_4, window_bounds = array<i64: 8, 1>}, {transform_indices = @transform_5, window_bounds = array<i64: 1, 8, 128>}, {transform_indices = @transform_6, window_bounds = array<i64: 1, 8, 128>}]} {
    %c0 = arith.constant 0 : index
    %c0_0 = arith.constant 0 : index
    %c0_1 = arith.constant 0 : index
    %0 = vector.load %arg1[%c0, %c0_0, %c0_1] : memref<3x16x4xf32, #tpu.memory_space<vmem>>, vector<1x16x4xf32>
    %1 = vector.shape_cast %0 : vector<1x16x4xf32> to vector<16x4xf32>
    %c0_2 = arith.constant 0 : index
    %c0_3 = arith.constant 0 : index
    %c0_4 = arith.constant 0 : index
    %2 = vector.load %arg2[%c0_2, %c0_3, %c0_4] : memref<1x4x130xf32, #tpu.memory_space<vmem>>, vector<1x4x128xf32>
    %3 = vector.shape_cast %2 : vector<1x4x128xf32> to vector<4x128xf32>
    %c0_5 = arith.constant 0 : index
    %c0_6 = arith.constant 0 : index
    %c0_7 = arith.constant 0 : index
    %4 = vector.load %arg3[%c0_5, %c0_6, %c0_7] : memref<1x4x130xf32, #tpu.memory_space<vmem>>, vector<1x4x128xf32>
    %5 = vector.shape_cast %4 : vector<1x4x128xf32> to vector<4x128xf32>
    %cst = arith.constant dense<0.000000e+00> : vector<16x128xf32>
    %6 = tpu.matmul %1, %3, %cst {dimension_numbers = #tpu.dot_dimension_numbers<[1], [0], [0], [1], [0, 0, 1, 1], [], []>} : vector<16x4xf32>, vector<4x128xf32>, vector<16x128xf32> -> vector<16x128xf32>
    %cst_8 = arith.constant dense<0.000000e+00> : vector<16x128xf32>
    %7 = tpu.matmul %1, %5, %cst_8 {dimension_numbers = #tpu.dot_dimension_numbers<[1], [0], [0], [1], [0, 0, 1, 1], [], []>} : vector<16x4xf32>, vector<4x128xf32>, vector<16x128xf32> -> vector<16x128xf32>
    %c1 = arith.constant 1 : index
    %c0_9 = arith.constant 0 : index
    %c0_10 = arith.constant 0 : index
    %8 = vector.load %arg1[%c1, %c0_9, %c0_10] : memref<3x16x4xf32, #tpu.memory_space<vmem>>, vector<1x16x4xf32>
    %9 = vector.shape_cast %8 : vector<1x16x4xf32> to vector<16x4xf32>
    %c0_11 = arith.constant 0 : index
    %c0_12 = arith.constant 0 : index
    %c1_13 = arith.constant 1 : index
    %10 = vector.load %arg2[%c0_11, %c0_12, %c1_13] : memref<1x4x130xf32, #tpu.memory_space<vmem>>, vector<1x4x128xf32>
    %11 = vector.shape_cast %10 : vector<1x4x128xf32> to vector<4x128xf32>
    %c0_14 = arith.constant 0 : index
    %c0_15 = arith.constant 0 : index
    %c1_16 = arith.constant 1 : index
    %12 = vector.load %arg3[%c0_14, %c0_15, %c1_16] : memref<1x4x130xf32, #tpu.memory_space<vmem>>, vector<1x4x128xf32>
    %13 = vector.shape_cast %12 : vector<1x4x128xf32> to vector<4x128xf32>
    %cst_17 = arith.constant dense<0.000000e+00> : vector<16x128xf32>
    %14 = tpu.matmul %9, %11, %cst_17 {dimension_numbers = #tpu.dot_dimension_numbers<[1], [0], [0], [1], [0, 0, 1, 1], [], []>} : vector<16x4xf32>, vector<4x128xf32>, vector<16x128xf32> -> vector<16x128xf32>
    %cst_18 = arith.constant dense<0.000000e+00> : vector<16x128xf32>
    %15 = tpu.matmul %9, %13, %cst_18 {dimension_numbers = #tpu.dot_dimension_numbers<[1], [0], [0], [1], [0, 0, 1, 1], [], []>} : vector<16x4xf32>, vector<4x128xf32>, vector<16x128xf32> -> vector<16x128xf32>
    %16 = arith.addf %6, %14 : vector<16x128xf32>
    %17 = arith.addf %7, %15 : vector<16x128xf32>
    %c2 = arith.constant 2 : index
    %c0_19 = arith.constant 0 : index
    %c0_20 = arith.constant 0 : index
    %18 = vector.load %arg1[%c2, %c0_19, %c0_20] : memref<3x16x4xf32, #tpu.memory_space<vmem>>, vector<1x16x4xf32>
    %19 = vector.shape_cast %18 : vector<1x16x4xf32> to vector<16x4xf32>
    %c0_21 = arith.constant 0 : index
    %c0_22 = arith.constant 0 : index
    %c2_23 = arith.constant 2 : index
    %20 = vector.load %arg2[%c0_21, %c0_22, %c2_23] : memref<1x4x130xf32, #tpu.memory_space<vmem>>, vector<1x4x128xf32>
    %21 = vector.shape_cast %20 : vector<1x4x128xf32> to vector<4x128xf32>
    %c0_24 = arith.constant 0 : index
    %c0_25 = arith.constant 0 : index
    %c2_26 = arith.constant 2 : index
    %22 = vector.load %arg3[%c0_24, %c0_25, %c2_26] : memref<1x4x130xf32, #tpu.memory_space<vmem>>, vector<1x4x128xf32>
    %23 = vector.shape_cast %22 : vector<1x4x128xf32> to vector<4x128xf32>
    %cst_27 = arith.constant dense<0.000000e+00> : vector<16x128xf32>
    %24 = tpu.matmul %19, %21, %cst_27 {dimension_numbers = #tpu.dot_dimension_numbers<[1], [0], [0], [1], [0, 0, 1, 1], [], []>} : vector<16x4xf32>, vector<4x128xf32>, vector<16x128xf32> -> vector<16x128xf32>
    %cst_28 = arith.constant dense<0.000000e+00> : vector<16x128xf32>
    %25 = tpu.matmul %19, %23, %cst_28 {dimension_numbers = #tpu.dot_dimension_numbers<[1], [0], [0], [1], [0, 0, 1, 1], [], []>} : vector<16x4xf32>, vector<4x128xf32>, vector<16x128xf32> -> vector<16x128xf32>
    %26 = arith.addf %16, %24 : vector<16x128xf32>
    %27 = arith.addf %17, %25 : vector<16x128xf32>
    %28 = vector.extract_strided_slice %26 {offsets = [0, 0], sizes = [8, 128], strides = [1, 1]} : vector<16x128xf32> to vector<8x128xf32>
    %29 = vector.extract_strided_slice %26 {offsets = [8, 0], sizes = [8, 128], strides = [1, 1]} : vector<16x128xf32> to vector<8x128xf32>
    %30 = vector.extract_strided_slice %27 {offsets = [0, 0], sizes = [8, 128], strides = [1, 1]} : vector<16x128xf32> to vector<8x128xf32>
    %31 = vector.extract_strided_slice %27 {offsets = [8, 0], sizes = [8, 128], strides = [1, 1]} : vector<16x128xf32> to vector<8x128xf32>
    %32 = arith.subf %28, %31 : vector<8x128xf32>
    %c0_29 = arith.constant 0 : index
    %c0_30 = arith.constant 0 : index
    %33 = vector.load %arg5[%c0_29, %c0_30] : memref<8x1xf32, #tpu.memory_space<vmem>>, vector<8x1xf32>
    %34 = vector.broadcast %33 : vector<8x1xf32> to vector<8x128xf32>
    %35 = arith.addf %32, %34 : vector<8x128xf32>
    %c0_31 = arith.constant 0 : index
    %c0_32 = arith.constant 0 : index
    %c0_33 = arith.constant 0 : index
    %36 = vector.load %arg6[%c0_31, %c0_32, %c0_33] : memref<1x8x128xf32, #tpu.memory_space<vmem>>, vector<1x8x128xf32>
    %37 = vector.shape_cast %36 : vector<1x8x128xf32> to vector<8x128xf32>
    %38 = vector.shape_cast %35 : vector<8x128xf32> to vector<1x8x128xf32>
    tpu.vector_store %arg6[%c0_31, %c0_32, %c0_33], %38 {strides = array<i32>} : memref<1x8x128xf32, #tpu.memory_space<vmem>>, vector<1x8x128xf32>,
    %39 = arith.addf %30, %29 : vector<8x128xf32>
    %c0_34 = arith.constant 0 : index
    %c0_35 = arith.constant 0 : index
    %40 = vector.load %arg4[%c0_34, %c0_35] : memref<8x1xf32, #tpu.memory_space<vmem>>, vector<8x1xf32>
    %41 = vector.broadcast %40 : vector<8x1xf32> to vector<8x128xf32>
    %42 = arith.addf %39, %41 : vector<8x128xf32>
    %c0_36 = arith.constant 0 : index
    %c0_37 = arith.constant 0 : index
    %c0_38 = arith.constant 0 : index
    %43 = vector.load %arg7[%c0_36, %c0_37, %c0_38] : memref<1x8x128xf32, #tpu.memory_space<vmem>>, vector<1x8x128xf32>
    %44 = vector.shape_cast %43 : vector<1x8x128xf32> to vector<8x128xf32>
    %45 = vector.shape_cast %42 : vector<8x128xf32> to vector<1x8x128xf32>
    tpu.vector_store %arg7[%c0_36, %c0_37, %c0_38], %45 {strides = array<i32>} : memref<1x8x128xf32, #tpu.memory_space<vmem>>, vector<1x8x128xf32>,
    return
  }
  func.func @transform_0(%arg0: i32) -> (i32, i32, i32) {
    %c0_i32 = arith.constant 0 : i32
    %c0_i32_0 = arith.constant 0 : i32
    %c0_i32_1 = arith.constant 0 : i32
    %c0_i32_2 = arith.constant 0 : i32
    return %c0_i32, %c0_i32_0, %c0_i32_1 : i32, i32, i32
  }
  func.func @transform_1(%arg0: i32) -> (i32, i32, i32) {
    %c0_i32 = arith.constant 0 : i32
    %c0_i32_0 = arith.constant 0 : i32
    %c0_i32_1 = arith.constant 0 : i32
    return %arg0, %c0_i32, %c0_i32_0 : i32, i32, i32
  }
  func.func @transform_2(%arg0: i32) -> (i32, i32, i32) {
    %c0_i32 = arith.constant 0 : i32
    %c0_i32_0 = arith.constant 0 : i32
    %c0_i32_1 = arith.constant 0 : i32
    return %arg0, %c0_i32, %c0_i32_0 : i32, i32, i32
  }
  func.func @transform_3(%arg0: i32) -> (i32, i32) {
    %c0_i32 = arith.constant 0 : i32
    %c0_i32_0 = arith.constant 0 : i32
    %c0_i32_1 = arith.constant 0 : i32
    return %c0_i32, %c0_i32_0 : i32, i32
  }
  func.func @transform_4(%arg0: i32) -> (i32, i32) {
    %c0_i32 = arith.constant 0 : i32
    %c0_i32_0 = arith.constant 0 : i32
    %c0_i32_1 = arith.constant 0 : i32
    return %c0_i32, %c0_i32_0 : i32, i32
  }
  func.func @transform_5(%arg0: i32) -> (i32, i32, i32) {
    %c0_i32 = arith.constant 0 : i32
    %c0_i32_0 = arith.constant 0 : i32
    %c0_i32_1 = arith.constant 0 : i32
    return %arg0, %c0_i32, %c0_i32_0 : i32, i32, i32
  }
  func.func @transform_6(%arg0: i32) -> (i32, i32, i32) {
    %c0_i32 = arith.constant 0 : i32
    %c0_i32_0 = arith.constant 0 : i32
    %c0_i32_1 = arith.constant 0 : i32
    return %arg0, %c0_i32, %c0_i32_0 : i32, i32, i32
  }
}

</mosaic_0001>

<bundles_post_ra>
// kernel: tpu_custom_call.1
= control target key start
LH: loop header
LB: loop body
LE: loop exit
PB: predicated region body
PF: predicated region fallthrough
CT: control target
= control target key end

     0   :  { %12 = vsyncpa [#allocation3], 0  ;;  %s1057_s0 = inlined_call_operand.vmem [shape: f32[3,16,4], index: 0, kind: input, shape index: {}]   ;;  %s1058_s1 = inlined_call_operand.vmem [shape: f32[2,4,130], index: 1, kind: input, shape index: {}]   ;;  %s1059_s2 = inlined_call_operand.vmem [shape: f32[2,4,130], index: 2, kind: input, shape index: {}]   ;;  %s1060_s3 = inlined_call_operand.vmem [shape: f32[8,1], index: 3, kind: input, shape index: {}]   ;;  %s1061_s4 = inlined_call_operand.vmem [shape: f32[8,1], index: 4, kind: input, shape index: {}]   ;;  %s1062_s5 = inlined_call_operand.hbm [shape: f32[2,8,128], index: 5, kind: output, shape index: {0}]   ;;  %s1063_s6 = inlined_call_operand.hbm [shape: f32[2,8,128], index: 6, kind: output, shape index: {1}]  }
   0x1   :  { %14 = vsyncpa [#allocation3 + $0x1], 0 }
   0x2   :  { %15 = vsyncpa [#allocation5], 0 }
   0x3   :  { %17 = vsyncpa [#allocation5 + $0x1], 0  ;;  %s891_s21 = smov 0   ;;  %s893_s22 = smov 0  }
   0x4   :  { %s895_s23 = smov 0   ;;  %s897_s24 = smov 0  }
   0x5 LB: > { %s912_s25 = sadd.s32 4294967295, %s851_s24   ;;  %s666_s26 = sadd.s32 4294967294, %s851_s24   ;;  %s851_s24 = sphi %s897_s24, %s1071_s24   ;;  %s847_s23 = sphi %s895_s23, %s1070_s23   ;;  %s843_s22 = sphi %s893_s22, %s1069_s22   ;;  %s839_s21 = sphi %s891_s21, %s1068_s21  }
   0x6   : > { %s916_s27 = sadd.s32 1, %s851_s24   ;;  %s145_s28 = sadd.s32 1, %s847_s23 }
   0x7   : > { %s142_s29 = ssub.s32 %s851_s24, %s916_s27  ;;  %p155_p0 = scmp.ne.s32.totalorder %s847_s23, %s843_s22 }
   0x8   : > { %p143_p1 = scmp.eq.s32.totalorder %s142_s29, 0  ;;  %p156_p2 = scmp.eq.s32.totalorder %s912_s25, 1 }
   0x9   : > { %p161_p3 = scmp.ne.s32.totalorder %s843_s22, %s839_s21  ;;  %p162_p4 = scmp.eq.s32.totalorder %s666_s26, 1 }
   0xa   : > { %s927_s30 = scalar_select %p143_p1, %s847_s23, %s145_s28  }
   0xb   : > { %p929_p5 = por %p156_p2, %p155_p0  ;;  %p933_p6 = por %p162_p4, %p161_p3 }
   0xc   : > { %p669_p7 = scmp.ge.s32.totalorder %s851_s24, 1  ;;  %p231_p8 = scmp.lt.s32.totalorder %s851_s24, 3 }
   0xe   : > { %p232_p9 = pnand %p669_p7, %p231_p8 }
   0xf   : > { %p271_p10 = scmp.lt.s32.totalorder (!%p232_p9), %s912_s25, 1  ;;  %s853_s17 = smov (!%p232_p9), 127  }
  0x10   : > { %235 = sbr.rel (%p232_p9) target bundleno = 332 (0x14c), region = 40  ;;  %s854_s18 = smov (!%p232_p9), 126  }
  0x11   : > { %s1004_s20 = sand.u32 (!%p232_p9), 1, %s843_s22   ;;  %s700_s26 = sshll.u32 (!%p232_p9), %s912_s25, 3 }
  0x12   : > { %s1064_s28 = sshll.u32 (!%p232_p9), %s1004_s20, 3  ;;  %s543_s15 = scalar_lea.hbm (!%p232_p9), %s1062_s5, %s700_s26 }
  0x13   : > { %s270_s11 = scalar_lea.vmem (!%p232_p9), [#allocation4], %s1064_s28 }
  0x14   : > { %s559_s12 = sshll.u32 (!%p232_p9), %s270_s11, 4  ;;  %s560_s12 = int_to_ptr.vmem [resolvable:$true] %s559_s12 }
  0x15   : > { %s272_s9 = scalar_select %p271_p10, %s912_s25, 1  ;;  %v519_v12 = vld [vmem:[%s1060_s3] sm:$0xff]  ;;  %v855_v14 = vmov 0   ;;  %vm298_vm0 = vcmask 1039360   ;;  %vm438_vm1 = vcmask 1031168   ;;  %vm307_vm2 = vcmask 1043456  }
  0x16   : > { %v510_v13 = vld [vmem:[%s1061_s4] sm:$0xff]  ;;  %756 = vset.pattern.permute.xlu0 %v855_v14  ;;  %755 = vset.pattern.permute.xlu2 %v855_v14  ;;  %v677_v18 = vld [vmem:[%s1057_s0 + $0x18] sm:$0xff]  ;;  %vm300_vm3 = vcmask 31744   ;;  %v676_v19 = vld [vmem:[%s1057_s0 + $0x10] sm:$0xff] }
  0x17   : > { %s704_s10 = sshll.u32 %s272_s9, 3  ;;  %v281_v24 = vld [vmem:[%s1057_s0] sm:$0xff]  ;;  %v282_v30 = vld [vmem:[%s1057_s0 + $0x8] sm:$0xff]  ;;  %s777_s9 = scalar_lea.hbm %s1063_s6, 16 }
  0x18   : > { %s944_s13 = scalar_lea.vmem %s1058_s1, %s704_s10  ;;  %s950_s16 = scalar_lea.vmem %s1059_s2, %s704_s10  ;;  %v690_v27 = vld [vmem:[%s1057_s0 + $0x20] sm:$0xff]  ;;  %v691_v32 = vld [vmem:[%s1057_s0 + $0x28] sm:$0xff] }
  0x19   : > { %v288_v0 = vld [vmem:[%s944_s13] sm:$0xff]  ;;  %s557_s10 = scalar_lea.hbm %s1063_s6, %s700_s26 }
  0x1a   : > { %291 = vst [vmem:[#allocation1] ss:$2 sm:$0xff] %v288_v0  ;;  %v289_v1 = vld [vmem:[%s950_s16] sm:$0xff]  ;;  %s561_s14 = sshll.u32 %s557_s10, 4  ;;  %s562_s14 = int_to_ptr.hbm [resolvable:$true] %s561_s14 }
  0x1b   : > { %v283_v21 = vld [vmem:[%s944_s13] sm:$0xf] }
  0x1c   : > { %v284_v26 = vld [vmem:[%s950_s16] sm:$0xf]  ;;  %s533_s16 = scalar_lea.sflag [#allocation5], %s1004_s20 }
  0x21   : > { %v292_v2 = vld.sshfl [vmem:[#allocation1] sm:$0xff pattern:$0x75316420]  ;;  %v293_v3 = vld.sshfl [vmem:[#allocation1 + $0x8] sm:$0xff pattern:$0x75316420] }
  0x22   : > { %294 = vrot.lane.b32.xlu0 %v292_v2, %s853_s17  ;;  %334 = vst [vmem:[#allocation1] ss:$2 sm:$0xff] %v289_v1 }
  0x29   : > { %v335_v4 = vld.sshfl [vmem:[#allocation1] sm:$0xff pattern:$0x75316420]  ;;  %v336_v5 = vld.sshfl [vmem:[#allocation1 + $0x8] sm:$0xff pattern:$0x75316420] }
  0x2a   : > { %296 = vrot.lane.b32.xlu0 %v293_v3, %s853_s17  ;;  %337 = vrot.lane.b32.xlu1 %v335_v4, %s853_s17  ;;  %431 = vst [vmem:[#allocation1] ss:$2 sm:$0xff] %v288_v0 }
  0x31   : > { %v432_v6 = vld.sshfl [vmem:[#allocation1] sm:$0xff pattern:$0x75316420]  ;;  %v433_v7 = vld.sshfl [vmem:[#allocation1 + $0x8] sm:$0xff pattern:$0x75316420] }
  0x32   : > { %339 = vrot.lane.b32.xlu1 %v336_v5, %s853_s17  ;;  %472 = vst [vmem:[#allocation1] ss:$2 sm:$0xff] %v289_v1  ;;  %434 = vrot.lane.b32.xlu2 %v432_v6, %s854_s18  ;;  %s771_s17 = sshra.s32 %s562_s14, 4  ;;  %s772_s17 = int_to_ptr.hbm [resolvable:$true] %s771_s17 }
  0x33   : > { %p778_p0 = scmp.lt.s32.totalorder %s772_s17, %s1063_s6 }
  0x39   : > { %v474_v8 = vld.sshfl [vmem:[#allocation1 + $0x8] sm:$0xff pattern:$0x75316420]  ;;  %v473_v9 = vld.sshfl [vmem:[#allocation1] sm:$0xff pattern:$0x75316420] }
  0x3a   : > { %477 = vrot.lane.b32.xlu1 %v474_v8, %s854_s18  ;;  %475 = vrot.lane.b32.xlu0 %v473_v9, %s854_s18 }
  0x3b   : > { %436 = vrot.lane.b32.xlu2 %v433_v7, %s854_s18  ;;  %s773_s18 = scalar_lea.hbm %s772_s17, 8 }
  0x3c   : > { %p774_p11 = scmp.ne.s32.totalorder %s772_s17, %s773_s18  ;;  %p779_p1 = scmp.lt.s32.totalorder %s777_s9, %s773_s18 }
  0x3e   : > { %p775_p12 = pnand %p774_p11, %p929_p5  ;;  %p780_p2 = por %p779_p1, %p778_p0 }
  0x40   : > { %p776_p13 = pneg %p775_p12 }
  0x42   : > { %522 = vperm.xlu0 %756, %v519_v12   ;;  %p781_p3 = pnand %p780_p2, %p776_p13 }
  0x43   : > { %513 = vperm.xlu2 %755, %v510_v13  }
  0x8c   : > { %v435_v10 = vpop.permute.xlu2 %434 }
  0x94   : > { %v295_v11 = vpop.permute.xlu0 %294 }
  0x95   : > { %v437_v15 = vpop.permute.xlu2 %436 }
  0x96   : > { %v439_v22 = vsel %vm438_vm1, %v435_v10, %v437_v15 }
  0x9c   : > { %v297_v16 = vpop.permute.xlu0 %296  ;;  %v338_v17 = vpop.permute.xlu1 %337 }
  0x9d   : > { %v299_v20 = vsel %vm298_vm0, %v295_v11, %v297_v16 }
  0x9e   : > { %678 = vmatpush.msk.msra.mxu0 %vm307_vm2, %v299_v20  ;;  %706 = vmatpush.msk.msra.mxu2 %vm307_vm2, %v299_v20 }
  0x9f   : > { %680 = vmatmul.msk.f32.vlgmr.msra.gmra.mxu2 %vm300_vm3, %v677_v18  ;;  %679 = vmatmul.msk.f32.vlgmr.msra.gmra.mxu0 %vm300_vm3, %v676_v19 }
  0xa0   : > { %684 = vmatpush.msk.msrb.mxu2 %vm307_vm2, %v283_v21  ;;  %692 = vmatpush.msk.msrb.mxu0 %vm307_vm2, %v439_v22 }
  0xa4   : > { %v340_v23 = vpop.permute.xlu1 %339 }
  0xa5   : > { %v341_v25 = vsel %vm298_vm0, %v338_v17, %v340_v23 }
  0xa6   : > { %681 = vmatpush.msk.msra.mxu1 %vm307_vm2, %v341_v25  ;;  %707 = vmatpush.msk.msra.mxu3 %vm307_vm2, %v341_v25 }
  0xa7   : > { %683 = vmatmul.msk.f32.vlgmr.msra.gmra.mxu3 %vm300_vm3, %v677_v18  ;;  %685 = vmatmul.msk.f32.vlgmr.msrb.gmra.mxu2 %vm300_vm3, %v281_v24 }
  0xa8   : > { %687 = vmatpush.msk.msrb.mxu3 %vm307_vm2, %v284_v26  ;;  %682 = vmatmul.msk.f32.vlgmr.msra.gmra.mxu1 %vm300_vm3, %v676_v19 }
  0xa9   : > { %693 = vmatmul.msk.f32.vlgmr.msrb.gmra.mxu0 %vm300_vm3, %v690_v27 }
  0xac   : > { %v478_v28 = vpop.permute.xlu1 %477  ;;  %v476_v29 = vpop.permute.xlu0 %475 }
  0xad   : > { %v479_v31 = vsel %vm438_vm1, %v476_v29, %v478_v28 }
  0xae   : > { %695 = vmatpush.msk.msrb.mxu1 %vm307_vm2, %v479_v31 }
  0xaf   : > { %686 = vmatmul.msk.f32.gmra.mxu2 %vm300_vm3, %v282_v30  ;;  %688 = vmatmul.msk.f32.vlgmr.msrb.gmra.mxu3 %vm300_vm3, %v281_v24 }
  0xb0   : > { %696 = vmatmul.msk.f32.vlgmr.msrb.gmra.mxu1 %vm300_vm3, %v690_v27 }
  0xb1   : > { %694 = vmatmul.msk.f32.gmra.mxu0 %vm300_vm3, %v691_v32 }
  0xb4   : > { %v523_v47 = vpop.permute.xlu0 %522 }
  0xb7   : > { %689 = vmatmul.msk.f32.gmra.mxu3 %vm300_vm3, %v282_v30 }
  0xb8   : > { %697 = vmatmul.msk.f32.gmra.mxu1 %vm300_vm3, %v691_v32 }
 0x11c   : > { %v327_v33 = vpop.f32.mrf.mxu0 }
 0x122   : > { %v330_v34 = vpop.f32.mrf.mxu2 }
 0x125   : > { %v361_v35 = vpop.f32.mrf.mxu1 }
 0x126   : > { %v465_v36 = vpop.f32.mrf.mxu0 }
 0x12a   : > { %v364_v37 = vpop.f32.mrf.mxu3  ;;  %v393_v38 = vpop.f32.mrf.mxu2 }
 0x12b   : > { %v394_v49 = vadd.f32 %v393_v38, %v327_v33 }
 0x12d   : > { %v499_v39 = vpop.f32.mrf.mxu1 }
 0x12e   : > { %v468_v40 = vpop.f32.mrf.mxu0 }
 0x132   : > { %v396_v41 = vpop.f32.mrf.mxu2  ;;  %v419_v42 = vpop.f32.mrf.mxu3 }
 0x133   : > { %v397_v43 = vadd.f32 %v396_v41, %v330_v34  ;;  %v420_v44 = vadd.f32 %v419_v42, %v361_v35 }
 0x135   : > { %v506_v45 = vadd.f32 %v468_v40, %v397_v43  ;;  %v507_v46 = vadd.f32 %v499_v39, %v420_v44  ;;  %v502_v52 = vpop.f32.mrf.mxu1 }
 0x137   : > { %v518_v48 = vadd.f32 %v507_v46, %v506_v45 }
 0x139   : > { %v525_v50 = vadd.f32 %v523_v47, %v518_v48 }
 0x13a   : > { %v422_v51 = vpop.f32.mrf.mxu3 }
 0x13b   : > { %526 = vst [vmem:[%s270_s11] sm:$0xff] %v525_v50  ;;  %v423_v53 = vadd.f32 %v422_v51, %v364_v37 }
 0x13c   : > { %784 = shalt.err (!%p781_p3)
}
 0x13d   : > { %709 = dma.vmem_to_hbm [thread:$0]  (%p929_p5), %s560_s12, 128, %s562_s14, %s533_s16   ;;  %v505_v54 = vadd.f32 %v465_v36, %v394_v49  ;;  %v508_v55 = vadd.f32 %v502_v52, %v423_v53  ;;  %v514_v56 = vpop.permute.xlu2 %513 }
 0x13e   : > { %s1067_s26 = sshll.u32 %s1004_s20, 3  ;;  %s547_s13 = sshll.u32 %s543_s15, 4  ;;  %s548_s13 = int_to_ptr.hbm [resolvable:$true] %s547_s13 }
 0x13f   : > { %s263_s11 = scalar_lea.vmem [#allocation2], %s1067_s26  ;;  %v509_v57 = vsub.f32 %v505_v54, %v508_v55  ;;  %s528_s28 = scalar_lea.sflag [#allocation3], %s1004_s20 }
 0x140   : > { %s545_s25 = sshll.u32 %s263_s11, 4  ;;  %s799_s17 = sshra.s32 %s548_s13, 4  ;;  %s546_s25 = int_to_ptr.vmem [resolvable:$true] %s545_s25  ;;  %s800_s17 = int_to_ptr.hbm [resolvable:$true] %s799_s17 }
 0x141   : > { %v516_v58 = vadd.f32 %v514_v56, %v509_v57  ;;  %s801_s18 = scalar_lea.hbm %s800_s17, 8  ;;  %s805_s16 = scalar_lea.hbm %s1062_s5, 16 }
 0x142   : > { %p802_p4 = scmp.ne.s32.totalorder %s800_s17, %s801_s18  ;;  %p806_p9 = scmp.lt.s32.totalorder %s800_s17, %s1062_s5 }
 0x143   : > { %517 = vst [vmem:[%s263_s11] sm:$0xff] %v516_v58  ;;  %p807_p10 = scmp.lt.s32.totalorder %s805_s16, %s801_s18 }
 0x144   : > { %p803_p7 = pnand %p802_p4, %p929_p5 }
 0x145   : > { %p808_p11 = por %p807_p10, %p806_p9 }
 0x146   : > { %p804_p8 = pneg %p803_p7 }
 0x148   : > { %p809_p12 = pnand %p808_p11, %p804_p8 }
 0x14a   : > { %812 = shalt.err (!%p809_p12)
}
 0x14b   : > { %708 = dma.vmem_to_hbm [thread:$0]  (%p929_p5), %s546_s25, 128, %s548_s13, %s528_s28  }
 0x14c PF: > { %p719_p13 = scmp.ge.s32.totalorder %s851_s24, 2  ;;  %s573_s20 = sand.u32 1, %s839_s21  }
 0x14d   : > { %s574_s15 = scalar_lea.sflag [#allocation3], %s573_s20 }
 0x14e   : > { %p713_p0 = pnand %p719_p13, %p933_p6 }
 0x150   : > { %p714_p1 = pneg %p713_p0 }
 0x152   : > { %830 = dma.done.wait (%p714_p1), %s574_s15, 128  }
 0x153   : > { %832 = vsyncadd (%p714_p1), %s574_s15, 4294967168  ;;  %s584_s9 = scalar_lea.sflag [#allocation5], %s573_s20 }
 0x154   : > { %834 = dma.done.wait (%p714_p1), %s584_s9, 128  }
 0x155   : > { %836 = vsyncadd (%p714_p1), %s584_s9, 4294967168  ;;  %p20_p5 = scmp.ge.s32.totalorder %s916_s27, 4   ;;  %s1068_s21 = smov %s843_s22 }
 0x156   : > { %s1069_s22 = smov %s847_s23  ;;  %s1070_s23 = smov %s927_s30 }
 0x157   : > { %s1071_s24 = smov %s916_s27  ;;  %22 = sbr.rel (!%p20_p5) target bundleno = 5 (0x5), region = 97 }
 0x15c   :  { %590 = vsyncpa [#allocation3], 1 }
 0x15d   :  { %592 = vsyncpa [#allocation3 + $0x1], 1 }
 0x15e   :  { %593 = vsyncpa [#allocation5], 1 }
 0x15f   :  { %595 = vsyncpa [#allocation5 + $0x1], 1 }

</bundles_post_ra>
